<compile_context>
chip_gen: v6e
topology: v6e:2x2x1
jax: 0.10.0
libtpu: 0.0.40
codegen_flags: <defaults>
</compile_context>

<pallas_src>
import jax
import jax.numpy as jnp
from jax import lax
from jax.experimental import pallas as pl
from jax.experimental.pallas import tpu as pltpu


def _round_up(n, m):
    return ((n + m - 1) // m) * m


def _pick_divisor_tile(n, target):
    """Largest power-of-two tile (>=8) that divides n and is <= target."""
    for cand in (1024, 512, 256, 128, 64, 32, 16, 8):
        if cand <= target and n % cand == 0:
            return cand
    return n  # n is always a multiple of 8 by construction


# --------------------------------------------------------------------------
# Pre-projection kernel: y[b, n-tile] = x @ W (+ b).  Tiny FLOPs vs the joint.
# --------------------------------------------------------------------------
def _proj_kernel(x_ref, w_ref, b_ref, o_ref):
    # x_ref: (1, tN, F) f32, w_ref: (F, H) mxu dtype, b_ref: (1, H) f32
    o_ref[0] = (jnp.dot(x_ref[0].astype(w_ref.dtype), w_ref[...],
                        preferred_element_type=jnp.float32)
                + b_ref[...]).astype(o_ref.dtype)


def _proj(x, w, b_row, mxu_dtype, tile_n=512):
    """x: (B, N, F) with N % 8 == 0, w: (F, H), b_row: (1, H) -> (B, N, H) f32."""
    B, N, F = x.shape
    H = w.shape[1]
    tN = _pick_divisor_tile(N, tile_n)
    return pl.pallas_call(
        _proj_kernel,
        out_shape=jax.ShapeDtypeStruct((B, N, H), jnp.float32),
        grid_spec=pltpu.PrefetchScalarGridSpec(
            num_scalar_prefetch=0,
            grid=(B, N // tN),
            in_specs=[
                pl.BlockSpec((1, tN, F), lambda b, n: (b, n, 0)),
                pl.BlockSpec((F, H), lambda b, n: (0, 0)),
                pl.BlockSpec((1, H), lambda b, n: (0, 0)),
            ],
            out_specs=pl.BlockSpec((1, tN, H), lambda b, n: (b, n, 0)),
        ),
        compiler_params=pltpu.CompilerParams(
            dimension_semantics=("parallel", "parallel")),
    )(x, w.astype(mxu_dtype), b_row)


# --------------------------------------------------------------------------
# Joint kernel: grid = (B, T-tiles, U-tiles, V-tiles), V innermost.
# --------------------------------------------------------------------------
def _joint_kernel(henc_ref, hdec_ref, w2_ref, b2_ref, out_ref, act_ref):
    # henc_ref: (1, tT, H) f32 (b1 already folded in)
    # hdec_ref: (1, tU, H) f32
    # w2_ref:   (H, tV)    mxu dtype (bf16)
    # b2_ref:   (1, tV)    f32
    # out_ref:  (1, tT, tU, tV)
    # act_ref:  (tT*tU, H) mxu-dtype scratch: tanh'd activations of this block
    tT, tU, tV = out_ref.shape[1], out_ref.shape[2], out_ref.shape[3]

    # Fill the activation scratch once per (b, t, u) block; V is the innermost
    # ("arbitrary") axis so the scratch is reused for every V tile.
    @pl.when(pl.program_id(3) == 0)
    def _():
        h_dec = hdec_ref[0]                                    # (tU, H) f32

        def body(t, carry):
            # Stream one (tU, H) slab per T row; the (tT, tU, H) broadcast
            # intermediate is never materialized.  add + tanh in f32
            # (v5e VPU/EUP have no bf16 path).
            h_enc_row = henc_ref[0, pl.ds(t, 1), :]            # (1, H)
            h = jnp.tanh(h_dec + h_enc_row)                    # (tU, H)
            row0 = pl.multiple_of(t * tU, tU)
            act_ref[pl.ds(row0, tU), :] = h.astype(act_ref.dtype)
            return carry

        # Each iteration does O(tU*H) elementwise work, so loop overhead is
        # amortized; keep it rolled to bound code size at larger tT.
        lax.fori_loop(0, tT, body, 0, unroll=False)

    # One (tT*tU, H) x (H, tV) MXU matmul per grid step, f32 accumulation.
    out = jnp.dot(act_ref[...], w2_ref[...],
                  preferred_element_type=jnp.float32) + b2_ref[...]
    out_ref[0] = out.reshape(tT, tU, tV).astype(out_ref.dtype)


def jointnet_forward(enc, dec, w1, b1, w2, b2, *,
                     tile_t=16, tile_u=256, tile_v=512,
                     mxu_dtype=jnp.bfloat16, out_dtype=None):
    """enc: [B,T,E], dec: [B,U,D], w1: [E+D,H], b1: [H], w2: [H,V], b2: [V]."""
    B, T, E = enc.shape
    Bd, U, D = dec.shape
    assert B == Bd
    H = w1.shape[1]
    V = w2.shape[1]
    assert w1.shape[0] == E + D
    out_dtype = enc.dtype if out_dtype is None else out_dtype

    # --- Tile sizes: sublane-/lane-aligned, clamped to the (padded) problem. -
    tT = min(_round_up(tile_t, 8), _round_up(T, 8))
    tU = min(_round_up(tile_u, 8), _round_up(U, 8))
    tV = min(_round_up(tile_v, 128), _round_up(V, 128))   # lane-dense V tile

    Tp = _round_up(T, tT)
    Up = _round_up(U, tU)
    Vp = _round_up(V, tV)

    # Pad the (small) raw inputs so h_enc/h_dec come out already tile-aligned;
    # this avoids padding the larger (B, T, H)/(B, U, H) projections.
    if Tp != T:
        enc = jnp.pad(enc, ((0, 0), (0, Tp - T), (0, 0)))
    if Up != U:
        dec = jnp.pad(dec, ((0, 0), (0, Up - U), (0, 0)))

    # --- Pre-projections (split matmul; b1 folded into h_enc once). ---------
    h_enc = _proj(enc, w1[:E], b1.reshape(1, H).astype(jnp.float32), mxu_dtype)
    h_dec = _proj(dec, w1[E:], jnp.zeros((1, H), jnp.float32), mxu_dtype)

    w2p = w2 if Vp == V else jnp.pad(w2, ((0, 0), (0, Vp - V)))
    w2p = w2p.astype(mxu_dtype)
    b2p = b2 if Vp == V else jnp.pad(b2, (0, Vp - V))
    b2p = b2p.reshape(1, Vp).astype(jnp.float32)

    # V-tile axis innermost ("arbitrary"): the tanh scratch filled at v == 0 is
    # reused across V tiles; h_enc/h_dec block indices do not change across V,
    # so their tiles are not re-DMAed either.
    grid = (B, Tp // tT, Up // tU, Vp // tV)

    # VMEM budget: double-buffered blocks + persistent scratch + live temps,
    # clamped against the actual per-core VMEM capacity (64 MiB on v7x).
    w_item = jnp.dtype(mxu_dtype).itemsize
    out_item = jnp.dtype(out_dtype).itemsize
    vmem_needed = (2 * (tT * H * 4 + tU * H * 4 + H * tV * w_item + tV * 4
                        + tT * tU * tV * out_item)
                   + tT * tU * H * w_item           # activation scratch
                   + tT * tU * tV * 4               # f32 matmul result
                   + tU * H * 4)                    # live tanh slab
    try:
        vmem_cap = pltpu.get_tpu_info().vmem_capacity_bytes
    except Exception:
        vmem_cap = 64 << 20                          # conservative (v7x-safe)
    vmem_limit = min(max(int(1.25 * vmem_needed), 16 << 20),
                     (vmem_cap * 7) // 8)

    n_steps = B * (Tp // tT) * (Up // tU) * (Vp // tV)
    cost = pl.CostEstimate(
        flops=2 * B * Tp * Up * Vp * H,
        transcendentals=B * Tp * Up * H,
        bytes_accessed=(B * Tp * Up * Vp * out_item            # output writes
                        + B * Tp * H * 4 + B * Up * H * 4      # h_enc/h_dec
                        + n_steps * (H * tV * w_item + tV * 4)))  # W2/b2 reads

    out = pl.pallas_call(
        _joint_kernel,
        out_shape=jax.ShapeDtypeStruct((B, Tp, Up, Vp), out_dtype),
        grid_spec=pltpu.PrefetchScalarGridSpec(
            num_scalar_prefetch=0,
            grid=grid,
            in_specs=[
                pl.BlockSpec((1, tT, H), lambda b, t, u, v: (b, t, 0)),
                pl.BlockSpec((1, tU, H), lambda b, t, u, v: (b, u, 0)),
                pl.BlockSpec((H, tV), lambda b, t, u, v: (0, v)),
                pl.BlockSpec((1, tV), lambda b, t, u, v: (0, v)),
            ],
            out_specs=pl.BlockSpec((1, tT, tU, tV),
                                   lambda b, t, u, v: (b, t, u, v)),
            scratch_shapes=[pltpu.VMEM((tT * tU, H), mxu_dtype)],
        ),
        compiler_params=pltpu.CompilerParams(
            dimension_semantics=("parallel", "parallel", "parallel",
                                 "arbitrary"),
            vmem_limit_bytes=vmem_limit),
        cost_estimate=cost,
    )(h_enc, h_dec, w2p, b2p)

    if (Tp, Up, Vp) == (T, U, V):
        return out          # aligned case: no pad -> slice round trip
    return out[:, :T, :U, :V]


def jointnet_reference(enc, dec, w1, b1, w2, b2):
    # Pure-JAX reference matching the PyTorch 3-D path (full-precision matmuls).
    B, T, E = enc.shape
    _, U, D = dec.shape
    enc_b = jnp.broadcast_to(enc[:, :, None, :], (B, T, U, E))
    dec_b = jnp.broadcast_to(dec[:, None, :, :], (B, T, U, D))
    concat = jnp.concatenate([enc_b, dec_b], axis=-1)          # (B,T,U,E+D)
    h = jnp.tanh(jnp.dot(concat, w1,
                         precision=jax.lax.Precision.HIGHEST) + b1)
    return jnp.dot(h, w2, precision=jax.lax.Precision.HIGHEST) + b2


if __name__ == "__main__":
    # Small, deterministic example shapes (tile-aligned -> no pad/slice path).
    B, T, U = 2, 16, 8
    enc_dim, dec_dim = 16, 16
    input_size = enc_dim + dec_dim          # 32
    inner_dim = 64
    vocab_size = 128

    key = jax.random.PRNGKey(0)
    k_enc, k_dec, k_w1, k_b1, k_w2, k_b2 = jax.random.split(key, 6)

    enc = jax.random.normal(k_enc, (B, T, enc_dim), dtype=jnp.float32)
    dec = jax.random.normal(k_dec, (B, U, dec_dim), dtype=jnp.float32)

    # Parameters (stored already-transposed: y = x @ W + b).
    w1 = 0.1 * jax.random.normal(k_w1, (input_size, inner_dim), dtype=jnp.float32)
    b1 = 0.1 * jax.random.normal(k_b1, (inner_dim,), dtype=jnp.float32)
    w2 = 0.1 * jax.random.normal(k_w2, (inner_dim, vocab_size), dtype=jnp.float32)
    b2 = 0.1 * jax.random.normal(k_b2, (vocab_size,), dtype=jnp.float32)

    out = jointnet_forward(enc, dec, w1, b1, w2, b2)
    out = jax.block_until_ready(out)

    ref = jointnet_reference(enc, dec, w1, b1, w2, b2)
    assert out.shape == (B, T, U, vocab_size), out.shape
    # bf16 MXU operands with f32 accumulation -> loosened tolerance.
    max_err = float(jnp.max(jnp.abs(out - ref)))
    assert jnp.allclose(out, ref, atol=2e-2, rtol=2e-2), max_err

    print("KERNEL_OK")
</pallas_src>

<mosaic_0001>
module attributes {stable_mosaic.version = 11 : i64} {
  func.func @_proj_kernel(%arg0: i32, %arg1: i32, %arg2: memref<1x16x16xf32, #tpu.memory_space<vmem>>, %arg3: memref<16x64xbf16, #tpu.memory_space<vmem>>, %arg4: memref<1x64xf32, #tpu.memory_space<vmem>>, %arg5: memref<1x16x64xf32, #tpu.memory_space<vmem>>) attributes {dimension_semantics = [#tpu.dimension_semantics<parallel>, #tpu.dimension_semantics<parallel>], iteration_bounds = array<i64: 2, 1>, scalar_prefetch = 0 : i64, scratch_operands = 0 : i64, tpu.core_type = #tpu.core_type<tc>, window_params = [{transform_indices = @transform_0, window_bounds = array<i64: 1, 16, 16>}, {pipeline_mode = #tpu.pipeline_mode<synchronous>, transform_indices = @transform_1, window_bounds = array<i64: 16, 64>}, {pipeline_mode = #tpu.pipeline_mode<synchronous>, transform_indices = @transform_2, window_bounds = array<i64: 1, 64>}, {transform_indices = @transform_3, window_bounds = array<i64: 1, 16, 64>}]} {
    %c0 = arith.constant 0 : index
    %c0_0 = arith.constant 0 : index
    %c0_1 = arith.constant 0 : index
    %0 = vector.load %arg2[%c0, %c0_0, %c0_1] : memref<1x16x16xf32, #tpu.memory_space<vmem>>, vector<1x16x16xf32>
    %1 = vector.shape_cast %0 : vector<1x16x16xf32> to vector<16x16xf32>
    %2 = arith.truncf %1 : vector<16x16xf32> to vector<16x16xbf16>
    %c0_2 = arith.constant 0 : index
    %c0_3 = arith.constant 0 : index
    %3 = vector.load %arg3[%c0_2, %c0_3] : memref<16x64xbf16, #tpu.memory_space<vmem>>, vector<16x64xbf16>
    %cst = arith.constant dense<0.000000e+00> : vector<16x64xf32>
    %4 = tpu.matmul %2, %3, %cst {dimension_numbers = #tpu.dot_dimension_numbers<[1], [0], [0], [1], [0, 0, 1, 1], [], []>} : vector<16x16xbf16>, vector<16x64xbf16>, vector<16x64xf32> -> vector<16x64xf32>
    %c0_4 = arith.constant 0 : index
    %c0_5 = arith.constant 0 : index
    %5 = vector.load %arg4[%c0_4, %c0_5] : memref<1x64xf32, #tpu.memory_space<vmem>>, vector<1x64xf32>
    %6 = vector.broadcast %5 : vector<1x64xf32> to vector<16x64xf32>
    %7 = arith.addf %4, %6 : vector<16x64xf32>
    %c0_6 = arith.constant 0 : index
    %c0_7 = arith.constant 0 : index
    %c0_8 = arith.constant 0 : index
    %8 = vector.load %arg5[%c0_6, %c0_7, %c0_8] : memref<1x16x64xf32, #tpu.memory_space<vmem>>, vector<1x16x64xf32>
    %9 = vector.shape_cast %8 : vector<1x16x64xf32> to vector<16x64xf32>
    %10 = vector.shape_cast %7 : vector<16x64xf32> to vector<1x16x64xf32>
    tpu.vector_store %arg5[%c0_6, %c0_7, %c0_8], %10 {strides = array<i32>} : memref<1x16x64xf32, #tpu.memory_space<vmem>>, vector<1x16x64xf32>,
    return
  }
  func.func @transform_0(%arg0: i32, %arg1: i32) -> (i32, i32, i32) {
    %c0_i32 = arith.constant 0 : i32
    %c0_i32_0 = arith.constant 0 : i32
    return %arg0, %arg1, %c0_i32 : i32, i32, i32
  }
  func.func @transform_1(%arg0: i32, %arg1: i32) -> (i32, i32) {
    %c0_i32 = arith.constant 0 : i32
    %c0_i32_0 = arith.constant 0 : i32
    %c0_i32_1 = arith.constant 0 : i32
    return %c0_i32, %c0_i32_0 : i32, i32
  }
  func.func @transform_2(%arg0: i32, %arg1: i32) -> (i32, i32) {
    %c0_i32 = arith.constant 0 : i32
    %c0_i32_0 = arith.constant 0 : i32
    %c0_i32_1 = arith.constant 0 : i32
    return %c0_i32, %c0_i32_0 : i32, i32
  }
  func.func @transform_3(%arg0: i32, %arg1: i32) -> (i32, i32, i32) {
    %c0_i32 = arith.constant 0 : i32
    %c0_i32_0 = arith.constant 0 : i32
    return %arg0, %arg1, %c0_i32 : i32, i32, i32
  }
}

</mosaic_0001>

<bundles_post_ra>
// kernel: tpu_custom_call.1
= control target key start
LH: loop header
LB: loop body
LE: loop exit
PB: predicated region body
PF: predicated region fallthrough
CT: control target
= control target key end

     0   :  { %8 = vsyncpa [#allocation3], 0  ;;  %s871_s0 = inlined_call_operand.hbm [shape: f32[2,16,16], index: 0, kind: input, shape index: {}]   ;;  %s872_s1 = inlined_call_operand.hbm [shape: bf16[16,64], index: 1, kind: input, shape index: {}]   ;;  %s873_s2 = inlined_call_operand.vmem [shape: f32[1,64], index: 2, kind: input, shape index: {}]   ;;  %s874_s3 = inlined_call_operand.hbm [shape: f32[2,16,64], index: 3, kind: output, shape index: {}]  }
   0x1   :  { %10 = vsyncpa [#allocation3 + $0x1], 0 }
   0x2   :  { %11 = vsyncpa [#allocation6], 0 }
   0x3   :  { %12 = vsyncpa [#allocation4], 0 }
   0x4   :  { %14 = vsyncpa [#allocation4 + $0x1], 0  ;;  %s687_s12 = smov 0   ;;  %s689_s13 = smov 0  }
   0x5   :  { %s691_s14 = smov 0   ;;  %s693_s15 = smov 0  }
   0x6   :  { %s695_s16 = smov 0   ;;  %s697_s17 = smov 0  }
   0x7 LB: > { %s404_s18 = sadd.s32 4294967295, %s654_s17   ;;  %s405_s19 = sadd.s32 4294967294, %s654_s17   ;;  %s654_s17 = sphi %s697_s17, %s20_s17   ;;  %s650_s16 = sphi %s695_s16, %s892_s16   ;;  %s646_s15 = sphi %s693_s15, %s891_s15   ;;  %s642_s14 = sphi %s691_s14, %s890_s14   ;;  %s638_s13 = sphi %s689_s13, %s889_s13   ;;  %s634_s12 = sphi %s687_s12, %s888_s12  }
   0x8   : > { %p54_p0 = scmp.ne.s32.totalorder %s638_s13, %s634_s12  ;;  %p721_p1 = scmp.eq.s32.totalorder %s404_s18, 0 }
   0x9   : > { %p725_p2 = scmp.eq.s32.totalorder %s404_s18, 1  ;;  %p128_p3 = scmp.eq.s32.totalorder %s405_s19, 1 }
   0xa   : > { %p731_p4 = por %p721_p1, %p54_p0  ;;  %p406_p5 = scmp.ge.s32.totalorder %s654_s17, 1 }
   0xb   : > { %p736_p6 = por %p128_p3, %p54_p0  ;;  %p135_p7 = scmp.lt.s32.totalorder %s654_s17, 3 }
   0xc   : > { %s878_s22 = scalar_select %p731_p4, 1, 0 }
   0xd   : > { %s879_s23 = scalar_select %p736_p6, 1, 0 }
   0xe   : > { %p741_p8 = pnand %p406_p5, %p135_p7  ;;  %s656_s25 = smov [#allocation5]  }
   0xf   : > { %s147_s26 = sshll.u32 %s656_s25, 4  ;;  %s32_s28 = sadd.s32 1, %s650_s16  ;;  %s148_s26 = int_to_ptr.vmem [resolvable:$true] %s147_s26 }
  0x10   : > { %p442_p9 = pneg %p741_p8  ;;  %s527_s29 = scalar_lea.vmem %s148_s26, 128 }
  0x11   : > { %p528_p13 = scmp.ne.s32.totalorder %s148_s26, %s527_s29  ;;  %p535_p5 = scmp.lt.s32.totalorder %s148_s26, %s148_s26 }
  0x12   : > { %p750_p11 = pnand %p442_p9, %p721_p1  ;;  %p536_p7 = scmp.lt.s32.totalorder %s527_s29, %s527_s29 }
  0x14   : > { %p518_p12 = pneg %p750_p11  ;;  %p537_p6 = por %p536_p7, %p535_p5 }
  0x16   : > { %p530_p0 = pnand %p528_p13, %p518_p12 }
  0x18   : > { %p531_p3 = pneg %p530_p0 }
  0x1a   : > { %p538_p4 = pnand %p537_p6, %p531_p3 }
  0x1c   : > { %541 = shalt.err (!%p538_p4)
}
  0x1d   : > { %s657_s30 = smov 64   ;;  %s658_s4 = smov 4  }
  0x1e   : > { %445 = dma.hbm_to_vmem [thread:$0]  (!%p750_p11), %s872_s1, 128, %s148_s26, [#allocation6], %s657_s30, %s657_s30, %s658_s4  }
  0x1f   : > { %p34_p6 = scmp.ge.s32.totalorder %s32_s28, 2  ;;  %s41_s7 = sadd.s32 1, %s642_s14 }
  0x20   : > { %p48_p4 = scmp.ne.s32.totalorder %s642_s14, %s638_s13  ;;  %p49_p9 = scmp.eq.s32.totalorder %s654_s17, 0 }
  0x21   : > { %s894_s28 = smov (%p34_p6, %s32_s28), 0  ;;  %p455_p0 = scmp.lt.s32.totalorder %s654_s17, 2 }
  0x22   : > { %p768_p12 = por %p49_p9, %p48_p4  ;;  %p774_p13 = por %p725_p2, %p48_p4 }
  0x23   : > { %s36_s10 = ssub.s32 %s650_s16, %s894_s28  ;;  %s164_s11 = sand.u32 1, %s642_s14  }
  0x24   : > { %p39_p11 = scmp.eq.s32.totalorder %s36_s10, 0  ;;  %s409_s18 = sshll.u32 %s164_s11, 4 }
  0x25   : > { %s424_s25 = sshll.u32 %s650_s16, 8  ;;  %s168_s30 = scalar_lea.vmem [#allocation2], %s409_s18 }
  0x26   : > { %s783_s19 = scalar_select %p39_p11, %s642_s14, %s41_s7  }
  0x27   : > { %s176_s29 = scalar_lea.hbm %s871_s0, %s424_s25  ;;  %s177_s4 = sshll.u32 %s168_s30, 4  ;;  %s178_s4 = int_to_ptr.vmem [resolvable:$true] %s177_s4 }
  0x28   : > { %p791_p2 = pnand %p455_p0, %p768_p12  ;;  %s165_s5 = scalar_lea.sflag [#allocation3], %s164_s11 }
  0x29   : > { %s555_s6 = scalar_lea.vmem %s178_s4, 256  ;;  %s659_s7 = smov [#allocation2]  }
  0x2a   : > { %p544_p3 = pneg %p791_p2  ;;  %p556_p5 = scmp.ne.s32.totalorder %s178_s4, %s555_s6 }
  0x2b   : > { %s560_s10 = sshll.u32 %s659_s7, 4  ;;  %s561_s10 = int_to_ptr.vmem [resolvable:$false] %s560_s10 }
  0x2c   : > { %p558_p7 = pnand %p556_p5, %p544_p3  ;;  %s562_s25 = scalar_lea.vmem %s561_s10, 512 }
  0x2d   : > { %p563_p4 = scmp.lt.s32.totalorder %s178_s4, %s561_s10  ;;  %p564_p9 = scmp.lt.s32.totalorder %s562_s25, %s555_s6 }
  0x2e   : > { %p559_p6 = pneg %p558_p7 }
  0x2f   : > { %p565_p11 = por %p564_p9, %p563_p4 }
  0x31   : > { %p566_p10 = pnand %p565_p11, %p559_p6 }
  0x33   : > { %569 = shalt.err (!%p566_p10)
}
  0x34   : > { %s660_s8 = smov 128   ;;  %s661_s18 = smov 8  }
  0x35   : > { %449 = dma.hbm_to_vmem [thread:$0]  (!%p791_p2), %s176_s29, 256, %s178_s4, %s165_s5, %s660_s8, %s660_s8, %s661_s18  }
  0x36   : > { %189 = sbr.rel (%p741_p8) target bundleno = 280 (0x118), region = 32  ;;  %s802_s11 = sand.u32 (!%p741_p8), 1, %s638_s13  }
  0x37   : > { %s413_s26 = sshll.u32 (!%p741_p8), %s802_s11, 4  ;;  %s192_s27 = scalar_lea.sflag (!%p741_p8), [#allocation3], %s802_s11 }
  0x38   : > { %s195_s30 = scalar_lea.vmem (!%p741_p8), [#allocation2], %s413_s26  ;;  %p885_p12 = scmp.ne.s32.totalorder (!%p741_p8), %s878_s22, 0 }
  0x3b   : > { %621 = dma.done.wait (%p885_p12), %s192_s27, 256  }
  0x3c   : > { %623 = vsyncadd (%p885_p12), %s192_s27, 4294967040 }
  0x3d   : > { %625 = dma.done.wait (%p721_p1), [#allocation6], 128  }
  0x3e   : > { %627 = vsyncadd (%p721_p1), [#allocation6], 4294967168  ;;  %v662_v0 = vmov 0.0   ;;  %vm663_vm0 = vmmov 0   ;;  %v515_v1 = vld [vmem:[#allocation5] sm:$0xff]   ;;  %v226_v3 = vld [vmem:[%s195_s30 + $0x8] sm:$0xff] }
  0x3f   : > { %428 = vmatprep.subr.bf16.mxu0 %v662_v0  ;;  %430 = vmatprep.mubr.msk.bf16.mxu0 %vm663_vm0, %v662_v0  ;;  %v225_v2 = vld [vmem:[%s195_s30] sm:$0xff]  ;;  %vm243_vm1 = vcmask 130048   ;;  %vm288_vm2 = vcmask 523264   ;;  %s221_s20 = scalar_lea.vmem [#allocation7], %s413_s26  ;;  %s425_s4 = sshll.u32 %s646_s15, 8 }
  0x40   : > { %429 = vmatpush3.bf16.msra.mxu0 %v515_v1  ;;  %v227_v4 = vpack.c.bf16 %v226_v3, %v225_v2  ;;  %v416_v5 = vld [vmem:[%s873_s2] ss:$0 sm:$0xff]  ;;  %s307_s29 = sshll.u32 %s221_s20, 4  ;;  %s823_s6 = scalar_lea.hbm %s874_s3, %s425_s4  ;;  %s818_s29 = int_to_ptr.vmem [resolvable:$true] %s307_s29 }
  0x41   : > { %s292_s7 = scalar_lea.sflag [#allocation4], %s802_s11  ;;  %s570_s10 = scalar_lea.vmem %s818_s29, 256 }
  0x42   : > { %p571_p1 = scmp.ne.s32.totalorder %s818_s29, %s570_s10  ;;  %s664_s15 = smov [#allocation7]  }
  0x43   : > { %431 = vmatmul.mubr.msk.bf16.vlgmr.msra.gmra.mxu0 %vm243_vm1, %v227_v4  ;;  %s574_s25 = sshll.u32 %s664_s15, 4  ;;  %s575_s25 = int_to_ptr.vmem [resolvable:$false] %s574_s25 }
  0x44   : > { %p572_p8 = pnand %p571_p1, %p774_p13  ;;  %s576_s8 = scalar_lea.vmem %s575_s25, 512 }
  0x45   : > { %p577_p0 = scmp.lt.s32.totalorder %s818_s29, %s575_s25  ;;  %p578_p2 = scmp.lt.s32.totalorder %s576_s8, %s570_s10 }
  0x46   : > { %p573_p10 = pneg %p572_p8 }
  0x47   : > { %p579_p3 = por %p578_p2, %p577_p0 }
  0x49   : > { %p580_p5 = pnand %p579_p3, %p573_p10 }
 0x103   : > { %v281_v6 = vpop.f32.mrf.mxu0 }
 0x104   : > { %v282_v7 = vadd.f32 %v416_v5, %v281_v6 }
 0x105   : > { %v432_v8 = vpop.f32.mrf.mxu0 }
 0x106   : > { %289 = vst.msk [vmem:[%s221_s20] sm:$0xff] %vm288_vm2, %v282_v7 }
 0x107   : > { %v284_v9 = vpop.f32.mrf.mxu0 }
 0x108   : > { %v285_v10 = vadd.f32 %v416_v5, %v284_v9 }
 0x109   : > { %v433_v11 = vpop.f32.mrf.mxu0 }
 0x10a   : > { %290 = vst.msk [vmem:[%s221_s20 + $0x8] sm:$0xff] %vm288_vm2, %v285_v10 }
 0x10b   : > { %583 = shalt.err (!%p580_p5)
}
 0x10c   : > { %s584_s18 = scalar_lea.hbm %s823_s6, 256  ;;  %s588_s30 = scalar_lea.hbm %s874_s3, 512 }
 0x10d   : > { %p585_p7 = scmp.ne.s32.totalorder %s823_s6, %s584_s18  ;;  %p589_p9 = scmp.lt.s32.totalorder %s823_s6, %s874_s3 }
 0x10e   : > { %p590_p11 = scmp.lt.s32.totalorder %s588_s30, %s584_s18 }
 0x10f   : > { %p586_p6 = pnand %p585_p7, %p774_p13 }
 0x110   : > { %p591_p12 = por %p590_p11, %p589_p9 }
 0x111   : > { %p587_p4 = pneg %p586_p6 }
 0x113   : > { %p592_p1 = pnand %p591_p12, %p587_p4 }
 0x115   : > { %595 = shalt.err (!%p592_p1)
}
 0x116   : > { %s665_s20 = smov 128   ;;  %s666_s4 = smov 8  }
 0x117   : > { %440 = dma.vmem_to_hbm [thread:$0]  (%p774_p13), %s818_s29, 256, %s823_s6, %s292_s7, %s665_s20, %s665_s20, %s666_s4  }
 0x118 PF: > { %s322_s21 = sand.u32 1, %s634_s12   ;;  %p886_p8 = scmp.ne.s32.totalorder %s879_s23, 0 }
 0x119   : > { %p887_p10 = scmp.ge.s32.totalorder %s654_s17, 2  ;;  %s323_s5 = scalar_lea.sflag [#allocation4], %s322_s21 }
 0x11b   : > { %p451_p0 = pnand %p887_p10, %p886_p8 }
 0x11d   : > { %p452_p2 = pneg %p451_p0 }
 0x11f   : > { %629 = dma.done.wait (%p452_p2), %s323_s5, 256  }
 0x120   : > { %631 = vsyncadd (%p452_p2), %s323_s5, 4294967040  ;;  %s20_s17 = sadd.s32 1, %s654_s17   ;;  %s888_s12 = smov %s638_s13 }
 0x121   : > { %p17_p3 = scmp.ge.s32.totalorder %s20_s17, 4   ;;  %s889_s13 = smov %s642_s14 }
 0x122   : > { %s890_s14 = smov %s783_s19  ;;  %s891_s15 = smov %s650_s16 }
 0x123   : > { %s892_s16 = smov %s894_s28  ;;  %19 = sbr.rel (!%p17_p3) target bundleno = 7 (0x7), region = 81 }
 0x128   :  { %328 = vsyncpa [#allocation3], 1 }
 0x129   :  { %330 = vsyncpa [#allocation3 + $0x1], 1 }
 0x12a   :  { %331 = vsyncpa [#allocation6], 1 }
 0x12b   :  { %332 = vsyncpa [#allocation4], 1 }
 0x12c   :  { %334 = vsyncpa [#allocation4 + $0x1], 1 }

</bundles_post_ra>
